<compile_context>
chip_gen: v7x
topology: tpu7x:2x2x1
jax: 0.10.0
libtpu: 0.0.40
codegen_flags: <defaults>
</compile_context>

<pallas_src>
import math
import jax
import jax.numpy as jnp
from jax.experimental import pallas as pl
from jax.experimental.pallas import tpu as pltpu

# TODO(synk): self.eps is never defined in the PyTorch __init__ (forward would
# raise); we use the canonical Charbonnier eps = 1e-6 (i.e. eps^2 for eps=1e-3).
EPS = 1e-6

LANES = 128
SUBLANES = 8
BLOCK_BYTES = 4 * 1024 * 1024      # per input per pipeline buffer
VMEM_LIMIT_BYTES = 32 * 1024 * 1024
NUM_CORE_SPLITS = 2                # leading "parallel" axis (2 TCs on v7x)


def _round_down(v, m):
    return (v // m) * m


def _cdiv(a, b):
    return -(-a // b)


def _charbonnier_sum_jax(x, y):
    d = x.astype(jnp.float32) - y.astype(jnp.float32)
    return jnp.sum(jnp.sqrt(d * d + EPS))


def _make_kernel(block_rows, chunk_rows, valid_last, last_c, last_i, needs_mask):
    """Builds the Charbonnier partial-sum kernel.

    Each grid step accumulates sqrt((x-y)^2+eps) of a (block_rows,128) tile
    into a resident (8,128) f32 accumulator, processing the tile in
    chunk_rows-row chunks so vector temporaries stay small.  If needs_mask,
    the last grid step keeps only the first `valid_last` rows of its block
    (the rest of the buffer is garbage from the clamped partial DMA).
    """
    n_chunks = block_rows // chunk_rows

    def kernel(x_ref, y_ref, o_ref):
        @pl.when(pl.program_id(1) == 0)
        def _init():
            o_ref[...] = jnp.zeros_like(o_ref)

        def accum_chunk(r0, masked):
            xs = x_ref[pl.ds(r0, chunk_rows), :].astype(jnp.float32)
            ys = y_ref[pl.ds(r0, chunk_rows), :].astype(jnp.float32)
            d = xs - ys
            err = jnp.sqrt(d * d + EPS)
            if masked:
                row = jax.lax.broadcasted_iota(jnp.int32, err.shape, 0) + r0
                err = jnp.where(row < valid_last, err, 0.0)
            # (chunk_rows,128) -> (chunk_rows//8, 8, 128): splits the sublane
            # axis at vreg boundaries; the axis-0 sum is elementwise VALU adds
            # (no per-step cross-lane XLU reduction).
            o_ref[...] += err.reshape(-1, SUBLANES, LANES).sum(axis=0)

        def accum_block(masked):
            if n_chunks == 1:
                accum_chunk(0, masked)
            else:
                def body(c, carry):
                    r0 = pl.multiple_of(c * chunk_rows, chunk_rows)
                    accum_chunk(r0, masked)
                    return carry
                jax.lax.fori_loop(0, n_chunks, body, 0, unroll=True)

        if needs_mask:
            is_last = jnp.logical_and(pl.program_id(0) == last_c,
                                      pl.program_id(1) == last_i)

            @pl.when(is_last)
            def _masked():
                accum_block(True)

            @pl.when(jnp.logical_not(is_last))
            def _unmasked():
                accum_block(False)
        else:
            accum_block(False)

    return kernel


def edge_loss(X, Y):
    """Charbonnier sum loss over all elements of X - Y."""
    assert X.shape == Y.shape
    x = X.reshape(-1)
    y = Y.reshape(-1)
    n = x.shape[0]
    if n == 0:
        return jnp.float32(0.0)

    itemsize = max(jnp.dtype(x.dtype).itemsize, jnp.dtype(y.dtype).itemsize)
    pack = max(1, 4 // itemsize)          # sublane packing: f32->1, bf16->2, int8->4
    align = SUBLANES * pack               # row alignment: 8 / 16 / 32
    rows = n // LANES
    rem = n - rows * LANES

    if rows < align:
        # Tiny input: plain JAX (a kernel launch would be pure overhead).
        return _charbonnier_sum_jax(x, y)

    if rem == 0:
        # Free (contiguous) reshape — no pad, no copy.
        x2d = x.reshape(rows, LANES)
        y2d = y.reshape(rows, LANES)
    else:
        # TODO(synk): this slice materializes copies of both inputs; if the
        # ragged case matters in practice, pad to a multiple of 128 upstream.
        x2d = x[: rows * LANES].reshape(rows, LANES)
        y2d = y[: rows * LANES].reshape(rows, LANES)

    # Dtype-aware block sizing from a byte budget; chunk is the in-kernel
    # compute granularity (keeps f32 temporaries at <= ~1 MiB).
    chunk_rows = align * LANES                                   # 1024 f32 / 2048 bf16
    budget_rows = _round_down(BLOCK_BYTES // (LANES * itemsize), chunk_rows)
    if rows >= chunk_rows:
        block_rows = min(budget_rows, _round_down(rows, chunk_rows))
    else:
        block_rows = _round_down(rows, align)
    chunk_rows = min(chunk_rows, block_rows)

    num_blocks = _cdiv(rows, block_rows)
    # Split across the leading "parallel" axis only when it divides evenly —
    # no leftover blocks ever fall off the grid.
    if num_blocks % NUM_CORE_SPLITS == 0 and num_blocks >= 2 * NUM_CORE_SPLITS:
        num_splits = NUM_CORE_SPLITS
    else:
        num_splits = 1
    blocks_per_split = num_blocks // num_splits

    valid_last = rows - (num_blocks - 1) * block_rows   # rows valid in last block
    needs_mask = valid_last < block_rows
    last_c = num_splits - 1
    last_i = blocks_per_split - 1

    kernel = _make_kernel(block_rows, chunk_rows, valid_last, last_c, last_i,
                          needs_mask)

    in_map = lambda c, i: (c * blocks_per_split + i, 0)
    partials = pl.pallas_call(
        kernel,
        out_shape=jax.ShapeDtypeStruct((num_splits, SUBLANES, LANES), jnp.float32),
        grid_spec=pltpu.PrefetchScalarGridSpec(
            num_scalar_prefetch=0,
            grid=(num_splits, blocks_per_split),
            in_specs=[
                pl.BlockSpec((block_rows, LANES), in_map),
                pl.BlockSpec((block_rows, LANES), in_map),
            ],
            # Leading dim squeezed: each split owns its own resident (8,128)
            # accumulator block (index constant along the "arbitrary" axis).
            out_specs=pl.BlockSpec((None, SUBLANES, LANES), lambda c, i: (c, 0, 0)),
        ),
        compiler_params=pltpu.CompilerParams(
            dimension_semantics=("parallel", "arbitrary"),
            vmem_limit_bytes=VMEM_LIMIT_BYTES,
        ),
        cost_estimate=pl.CostEstimate(
            flops=4 * rows * LANES,
            transcendentals=rows * LANES,
            bytes_accessed=rows * LANES * (jnp.dtype(x.dtype).itemsize
                                           + jnp.dtype(y.dtype).itemsize)
                           + num_splits * SUBLANES * LANES * 4,
        ),
    )(x2d, y2d)

    # Single cheap cross-lane/sublane reduction, done once outside the loop.
    loss = jnp.sum(partials)

    if rem:
        # <128-element lane remainder: negligible plain-JAX tail.
        loss = loss + _charbonnier_sum_jax(x[rows * LANES:], y[rows * LANES:])
    return loss


def init_edge_loss_params(key):
    """Deterministic init of the (unused-by-forward) conv_edge weights:
    Conv2d(3, 3, kernel_size=15, bias=False), N(0, sqrt(2 / (15*15*3)))."""
    j = 15 * 15 * 3
    std = math.sqrt(2.0 / j)
    w = jax.random.normal(key, (3, 3, 15, 15), dtype=jnp.float32) * std  # OIHW
    return {"conv_edge_weight": w}


if __name__ == "__main__":
    key = jax.random.PRNGKey(0)
    k_w, k_x, k_y = jax.random.split(key, 3)

    params = init_edge_loss_params(k_w)  # parity with __init__; unused in forward

    # Primary case (f32): exercises multi-block grid + masked partial last block.
    B, C, H, W = 2, 3, 16, 16
    X = jax.random.normal(k_x, (B, C, H, W), dtype=jnp.float32)
    Y = jax.random.normal(k_y, (B, C, H, W), dtype=jnp.float32)
    loss = edge_loss(X, Y)
    jax.block_until_ready(loss)
    ref = _charbonnier_sum_jax(X.reshape(-1), Y.reshape(-1))
    assert jnp.allclose(loss, ref, rtol=1e-5, atol=1e-3), (loss, ref)

    # Secondary case (bf16): exercises dtype-aware block sizing + in-kernel upcast.
    Xb = jax.random.normal(k_x, (2, 3, 16, 32), dtype=jnp.bfloat16)
    Yb = jax.random.normal(k_y, (2, 3, 16, 32), dtype=jnp.bfloat16)
    loss_b = edge_loss(Xb, Yb)
    jax.block_until_ready(loss_b)
    ref_b = _charbonnier_sum_jax(Xb.reshape(-1), Yb.reshape(-1))
    assert jnp.allclose(loss_b, ref_b, rtol=1e-5, atol=1e-3), (loss_b, ref_b)

    print("KERNEL_OK")
</pallas_src>

<mosaic_0001>
module attributes {stable_mosaic.version = 11 : i64} {
  func.func @kernel(%arg0: i32, %arg1: i32, %arg2: memref<8x128xf32, #tpu.memory_space<vmem>>, %arg3: memref<8x128xf32, #tpu.memory_space<vmem>>, %arg4: memref<1x8x128xf32, #tpu.memory_space<vmem>>) attributes {dimension_semantics = [#tpu.dimension_semantics<parallel>, #tpu.dimension_semantics<arbitrary>], iteration_bounds = array<i64: 1, 2>, scalar_prefetch = 0 : i64, scratch_operands = 0 : i64, tpu.core_type = #tpu.core_type<tc>, window_params = [{transform_indices = @transform_0, window_bounds = array<i64: 8, 128>}, {transform_indices = @transform_1, window_bounds = array<i64: 8, 128>}, {transform_indices = @transform_2, window_bounds = array<i64: 1, 8, 128>}]} {
    %c0_i32 = arith.constant 0 : i32
    %0 = arith.cmpi eq, %arg1, %c0_i32 : i32
    %1 = arith.extui %0 : i1 to i32
    %c0_i32_0 = arith.constant 0 : i32
    %2 = arith.cmpi ne, %1, %c0_i32_0 : i32
    scf.if %2 {
      %cst = arith.constant 0.000000e+00 : f32
      %11 = vector.broadcast %cst : f32 to vector<8x128xf32>
      %c0 = arith.constant 0 : index
      %c0_4 = arith.constant 0 : index
      %c0_5 = arith.constant 0 : index
      %12 = vector.load %arg4[%c0, %c0_4, %c0_5] : memref<1x8x128xf32, #tpu.memory_space<vmem>>, vector<1x8x128xf32>
      %13 = vector.shape_cast %12 : vector<1x8x128xf32> to vector<8x128xf32>
      %14 = vector.shape_cast %11 : vector<8x128xf32> to vector<1x8x128xf32>
      tpu.vector_store %arg4[%c0, %c0_4, %c0_5], %14 {strides = array<i32>} : memref<1x8x128xf32, #tpu.memory_space<vmem>>, vector<1x8x128xf32>,
    } else {
    }
    %c0_i32_1 = arith.constant 0 : i32
    %3 = arith.cmpi eq, %arg0, %c0_i32_1 : i32
    %c1_i32 = arith.constant 1 : i32
    %4 = arith.cmpi eq, %arg1, %c1_i32 : i32
    %5 = arith.andi %3, %4 : i1
    %6 = arith.extui %5 : i1 to i32
    %c0_i32_2 = arith.constant 0 : i32
    %7 = arith.cmpi ne, %6, %c0_i32_2 : i32
    scf.if %7 {
      %c0 = arith.constant 0 : index
      %c0_4 = arith.constant 0 : index
      %11 = vector.load %arg2[%c0, %c0_4] : memref<8x128xf32, #tpu.memory_space<vmem>>, vector<8x128xf32>
      %c0_5 = arith.constant 0 : index
      %c0_6 = arith.constant 0 : index
      %12 = vector.load %arg3[%c0_5, %c0_6] : memref<8x128xf32, #tpu.memory_space<vmem>>, vector<8x128xf32>
      %13 = arith.subf %11, %12 : vector<8x128xf32>
      %14 = arith.mulf %13, %13 : vector<8x128xf32>
      %cst = arith.constant 9.99999997E-7 : f32
      %15 = vector.broadcast %cst : f32 to vector<8x128xf32>
      %16 = arith.addf %14, %15 : vector<8x128xf32>
      %17 = math.sqrt %16 : vector<8x128xf32>
      %18 = tpu.iota {dimensions = array<i32: 0>} : vector<8x128xi32>
      %c0_i32_7 = arith.constant 0 : i32
      %19 = vector.broadcast %c0_i32_7 : i32 to vector<8x128xi32>
      %20 = arith.addi %18, %19 : vector<8x128xi32>
      %c4_i32 = arith.constant 4 : i32
      %21 = vector.broadcast %c4_i32 : i32 to vector<8x128xi32>
      %22 = arith.cmpi slt, %20, %21 : vector<8x128xi32>
      %cst_8 = arith.constant 0.000000e+00 : f32
      %23 = vector.broadcast %cst_8 : f32 to vector<8x128xf32>
      %24 = arith.select %22, %17, %23 : vector<8x128xi1>, vector<8x128xf32>
      %c0_9 = arith.constant 0 : index
      %c0_10 = arith.constant 0 : index
      %c0_11 = arith.constant 0 : index
      %25 = vector.load %arg4[%c0_9, %c0_10, %c0_11] : memref<1x8x128xf32, #tpu.memory_space<vmem>>, vector<1x8x128xf32>
      %26 = vector.shape_cast %25 : vector<1x8x128xf32> to vector<8x128xf32>
      %27 = vector.shape_cast %24 : vector<8x128xf32> to vector<1x8x128xf32>
      %cst_12 = arith.constant dense<0.000000e+00> : vector<8x128xf32>
      %28 = vector.multi_reduction <add>, %27, %cst_12 [0] : vector<1x8x128xf32> to vector<8x128xf32>
      %29 = arith.addf %26, %28 : vector<8x128xf32>
      %c0_13 = arith.constant 0 : index
      %c0_14 = arith.constant 0 : index
      %c0_15 = arith.constant 0 : index
      %30 = vector.load %arg4[%c0_13, %c0_14, %c0_15] : memref<1x8x128xf32, #tpu.memory_space<vmem>>, vector<1x8x128xf32>
      %31 = vector.shape_cast %30 : vector<1x8x128xf32> to vector<8x128xf32>
      %32 = vector.shape_cast %29 : vector<8x128xf32> to vector<1x8x128xf32>
      tpu.vector_store %arg4[%c0_13, %c0_14, %c0_15], %32 {strides = array<i32>} : memref<1x8x128xf32, #tpu.memory_space<vmem>>, vector<1x8x128xf32>,
    } else {
    }
    %true = arith.constant true
    %8 = arith.xori %5, %true : i1
    %9 = arith.extui %8 : i1 to i32
    %c0_i32_3 = arith.constant 0 : i32
    %10 = arith.cmpi ne, %9, %c0_i32_3 : i32
    scf.if %10 {
      %c0 = arith.constant 0 : index
      %c0_4 = arith.constant 0 : index
      %11 = vector.load %arg2[%c0, %c0_4] : memref<8x128xf32, #tpu.memory_space<vmem>>, vector<8x128xf32>
      %c0_5 = arith.constant 0 : index
      %c0_6 = arith.constant 0 : index
      %12 = vector.load %arg3[%c0_5, %c0_6] : memref<8x128xf32, #tpu.memory_space<vmem>>, vector<8x128xf32>
      %13 = arith.subf %11, %12 : vector<8x128xf32>
      %14 = arith.mulf %13, %13 : vector<8x128xf32>
      %cst = arith.constant 9.99999997E-7 : f32
      %15 = vector.broadcast %cst : f32 to vector<8x128xf32>
      %16 = arith.addf %14, %15 : vector<8x128xf32>
      %17 = math.sqrt %16 : vector<8x128xf32>
      %c0_7 = arith.constant 0 : index
      %c0_8 = arith.constant 0 : index
      %c0_9 = arith.constant 0 : index
      %18 = vector.load %arg4[%c0_7, %c0_8, %c0_9] : memref<1x8x128xf32, #tpu.memory_space<vmem>>, vector<1x8x128xf32>
      %19 = vector.shape_cast %18 : vector<1x8x128xf32> to vector<8x128xf32>
      %20 = vector.shape_cast %17 : vector<8x128xf32> to vector<1x8x128xf32>
      %cst_10 = arith.constant dense<0.000000e+00> : vector<8x128xf32>
      %21 = vector.multi_reduction <add>, %20, %cst_10 [0] : vector<1x8x128xf32> to vector<8x128xf32>
      %22 = arith.addf %19, %21 : vector<8x128xf32>
      %c0_11 = arith.constant 0 : index
      %c0_12 = arith.constant 0 : index
      %c0_13 = arith.constant 0 : index
      %23 = vector.load %arg4[%c0_11, %c0_12, %c0_13] : memref<1x8x128xf32, #tpu.memory_space<vmem>>, vector<1x8x128xf32>
      %24 = vector.shape_cast %23 : vector<1x8x128xf32> to vector<8x128xf32>
      %25 = vector.shape_cast %22 : vector<8x128xf32> to vector<1x8x128xf32>
      tpu.vector_store %arg4[%c0_11, %c0_12, %c0_13], %25 {strides = array<i32>} : memref<1x8x128xf32, #tpu.memory_space<vmem>>, vector<1x8x128xf32>,
    } else {
    }
    return
  }
  func.func @transform_0(%arg0: i32, %arg1: i32) -> (i32, i32) {
    %c2_i32 = arith.constant 2 : i32
    %0 = arith.muli %arg0, %c2_i32 : i32
    %1 = arith.addi %0, %arg1 : i32
    %c0_i32 = arith.constant 0 : i32
    %c0_i32_0 = arith.constant 0 : i32
    return %1, %c0_i32 : i32, i32
  }
  func.func @transform_1(%arg0: i32, %arg1: i32) -> (i32, i32) {
    %c2_i32 = arith.constant 2 : i32
    %0 = arith.muli %arg0, %c2_i32 : i32
    %1 = arith.addi %0, %arg1 : i32
    %c0_i32 = arith.constant 0 : i32
    %c0_i32_0 = arith.constant 0 : i32
    return %1, %c0_i32 : i32, i32
  }
  func.func @transform_2(%arg0: i32, %arg1: i32) -> (i32, i32, i32) {
    %c0_i32 = arith.constant 0 : i32
    %c0_i32_0 = arith.constant 0 : i32
    %c0_i32_1 = arith.constant 0 : i32
    return %arg0, %c0_i32, %c0_i32_0 : i32, i32, i32
  }
}

</mosaic_0001>

<bundles_post_ra>
// kernel: tpu_custom_call.1
= control target key start
LH: loop header
LB: loop body
LE: loop exit
PB: predicated region body
PF: predicated region fallthrough
CT: control target
= control target key end

     0   :  { %7 = vsyncpa [#allocation3], 0  ;;  %s829_s0 = inlined_call_operand.hbm [shape: f32[12,128], index: 0, kind: input, shape index: {}]   ;;  %s830_s1 = inlined_call_operand.hbm [shape: f32[12,128], index: 1, kind: input, shape index: {}]   ;;  %s831_s2 = inlined_call_operand.hbm [shape: f32[1,8,128], index: 2, kind: output, shape index: {}]  }
   0x1   :  { %9 = vsyncpa [#allocation3 + $0x1], 0 }
   0x2   :  { %10 = vsyncpa [#allocation6], 0 }
   0x3   :  { %12 = vsyncpa [#allocation6 + $0x1], 0 }
   0x4   :  { %13 = vsyncpa [#allocation4], 0  ;;  %s618_s9 = smov 0   ;;  %s620_s10 = smov 0  }
   0x5   :  { %s622_s11 = smov 0   ;;  %s624_s12 = smov 0  }
   0x6   :  { %s626_s13 = smov 0   ;;  %s628_s14 = smov 0  }
   0x7 LB: > { %s364_s15 = sadd.s32 4294967295, %s597_s14   ;;  %s28_s16 = sadd.s32 1, %s593_s13  ;;  %s597_s14 = sphi %s628_s14, %s19_s14   ;;  %s593_s13 = sphi %s626_s13, %s846_s13   ;;  %s589_s12 = sphi %s624_s12, %s845_s12   ;;  %s585_s11 = sphi %s622_s11, %s844_s11   ;;  %s581_s10 = sphi %s620_s10, %s843_s10   ;;  %s577_s9 = sphi %s618_s9, %s842_s9  }
   0x8   : > { %p29_p0 = scmp.ge.s32.totalorder %s28_s16, 2  ;;  %s42_s17 = sadd.s32 1, %s585_s11 }
   0x9   : > { %p49_p1 = scmp.ne.s32.totalorder %s585_s11, %s581_s10  ;;  %p50_p2 = scmp.eq.s32.totalorder %s597_s14, 0 }
   0xa   : > { %s848_s16 = smov (%p29_p0, %s28_s16), 0  ;;  %p55_p4 = scmp.ne.s32.totalorder %s581_s10, %s577_s9 }
   0xb   : > { %p654_p3 = por %p50_p2, %p49_p1  ;;  %s39_s19 = ssub.s32 %s593_s13, %s848_s16 }
   0xc   : > { %p56_p5 = scmp.eq.s32.totalorder %s364_s15, 0  ;;  %p40_p6 = scmp.eq.s32.totalorder %s39_s19, 0 }
   0xd   : > { %p396_p8 = scmp.lt.s32.totalorder %s597_s14, 2  ;;  %s672_s22 = sand.u32 1, %s585_s11  }
   0xe   : > { %p663_p7 = por %p56_p5, %p55_p4  ;;  %s368_s23 = sshll.u32 %s593_s13, 7 }
   0xf   : > { %s669_s21 = scalar_select %p40_p6, %s585_s11, %s42_s17  }
  0x10   : > { %s834_s20 = scalar_select %p663_p7, 1, 0 }
  0x11   : > { %s367_s24 = sshll.u32 %s672_s22, 3  ;;  %s681_s27 = scalar_lea.hbm %s829_s0, %s368_s23 }
  0x12   : > { %s139_s28 = scalar_lea.vmem [#allocation2], %s367_s24  ;;  %p687_p9 = pnand %p396_p8, %p654_p3 }
  0x13   : > { %s148_s29 = sshll.u32 %s139_s28, 4  ;;  %s136_s3 = scalar_lea.sflag [#allocation3], %s672_s22  ;;  %s691_s29 = int_to_ptr.vmem [resolvable:$true] %s148_s29 }
  0x14   : > { %s453_s4 = scalar_lea.hbm %s681_s27, 128  ;;  %p455_p13 = pneg %p687_p9 }
  0x15   : > { %p454_p12 = scmp.ne.s32.totalorder %s681_s27, %s453_s4  ;;  %s458_s7 = scalar_lea.hbm %s829_s0, 256 }
  0x16   : > { %p459_p2 = scmp.lt.u32.totalorder %s681_s27, %s829_s0  ;;  %p460_p3 = scmp.lt.u32.totalorder %s458_s7, %s453_s4 }
  0x17   : > { %p456_p0 = pnand %p455_p13, %p454_p12  ;;  %p462_p5 = scmp.lt.u32.totalorder %s453_s4, %s681_s27 }
  0x18   : > { %p461_p4 = por %p460_p3, %p459_p2 }
  0x19   : > { %p457_p1 = pneg %p456_p0 }
  0x1a   : > { %p463_p6 = por %p462_p5, %p461_p4 }
  0x1c   : > { %p464_p8 = pnand %p463_p6, %p457_p1 }
  0x1e   : > { %467 = shalt.err (!%p464_p8)
}
  0x1f   : > { %s468_s17 = scalar_lea.vmem %s691_s29, 128  ;;  %s599_s18 = smov [#allocation2]  }
  0x20   : > { %p469_p12 = scmp.ne.s32.totalorder %s691_s29, %s468_s17  ;;  %s473_s19 = sshll.u32 %s599_s18, 4  ;;  %s474_s19 = int_to_ptr.vmem [resolvable:$false] %s473_s19 }
  0x21   : > { %s475_s25 = scalar_lea.vmem %s474_s19, 256  ;;  %p476_p11 = scmp.lt.s32.totalorder %s691_s29, %s474_s19 }
  0x22   : > { %p471_p0 = pnand %p469_p12, %p455_p13  ;;  %p477_p2 = scmp.lt.s32.totalorder %s475_s25, %s468_s17 }
  0x24   : > { %p472_p10 = pneg %p471_p0  ;;  %p478_p3 = por %p477_p2, %p476_p11 }
  0x26   : > { %p479_p4 = pnand %p478_p3, %p472_p10 }
  0x28   : > { %482 = shalt.err (!%p479_p4)
}
  0x29   : > { %392 = dma.hbm_to_vmem [thread:$0]  (!%p687_p9), %s681_s27, 128, %s691_s29, %s136_s3  }
  0x2a   : > { %p836_p1 = scmp.lt.s32.totalorder %s597_s14, 3  ;;  %p837_p5 = scmp.ge.s32.totalorder %s597_s14, 1 }
  0x2b   : > { %s734_s5 = scalar_lea.hbm %s830_s1, %s368_s23  ;;  %s159_s6 = scalar_lea.vmem [#allocation5], %s367_s24 }
  0x2c   : > { %p725_p6 = pnand %p837_p5, %p836_p1  ;;  %s168_s7 = sshll.u32 %s159_s6, 4  ;;  %s169_s7 = int_to_ptr.vmem [resolvable:$true] %s168_s7 }
  0x2d   : > { %s156_s27 = scalar_lea.sflag [#allocation6], %s672_s22  ;;  %s483_s29 = scalar_lea.hbm %s734_s5, 128 }
  0x2e   : > { %s838_s26 = scalar_select %p725_p6, 1, 0 }
  0x2f   : > { %p484_p10 = scmp.ne.s32.totalorder %s734_s5, %s483_s29  ;;  %s488_s23 = scalar_lea.hbm %s830_s1, 256 }
  0x30   : > { %p489_p12 = scmp.lt.u32.totalorder %s734_s5, %s830_s1  ;;  %p490_p0 = scmp.lt.u32.totalorder %s488_s23, %s483_s29 }
  0x31   : > { %p486_p11 = pnand %p484_p10, %p455_p13  ;;  %p492_p3 = scmp.lt.u32.totalorder %s483_s29, %s734_s5 }
  0x32   : > { %p491_p2 = por %p490_p0, %p489_p12 }
  0x33   : > { %p487_p8 = pneg %p486_p11 }
  0x34   : > { %p493_p4 = por %p492_p3, %p491_p2 }
  0x36   : > { %p494_p1 = pnand %p493_p4, %p487_p8 }
  0x38   : > { %497 = shalt.err (!%p494_p1)
}
  0x39   : > { %s498_s22 = scalar_lea.vmem %s169_s7, 128  ;;  %s600_s24 = smov [#allocation5]  }
  0x3a   : > { %p499_p5 = scmp.ne.s32.totalorder %s169_s7, %s498_s22  ;;  %s503_s18 = sshll.u32 %s600_s24, 4  ;;  %s504_s18 = int_to_ptr.vmem [resolvable:$false] %s503_s18 }
  0x3b   : > { %s505_s19 = scalar_lea.vmem %s504_s18, 256  ;;  %p506_p7 = scmp.lt.s32.totalorder %s169_s7, %s504_s18 }
  0x3c   : > { %p501_p10 = pnand %p499_p5, %p455_p13  ;;  %p507_p6 = scmp.lt.s32.totalorder %s505_s19, %s498_s22 }
  0x3e   : > { %p502_p11 = pneg %p501_p10  ;;  %p508_p0 = por %p507_p6, %p506_p7 }
  0x40   : > { %p509_p12 = pnand %p508_p0, %p502_p11 }
  0x42   : > { %512 = shalt.err (!%p509_p12)
}
  0x43   : > { %395 = dma.hbm_to_vmem [thread:$0]  (!%p687_p9), %s734_s5, 128, %s169_s7, %s156_s27  }
  0x44   : > { %p839_p8 = scmp.ne.s32.totalorder %s838_s26, 0 }
  0x45   : > { %s179_s25 = sand.u32 (!%p839_p8), 1, %s581_s10   ;;  %p840_p13 = scmp.ne.s32.totalorder (!%p839_p8), %s834_s20, 0 }
  0x46   : > { %177 = sbr.rel (%p839_p8) target bundleno = 166 (0xa6), region = 28  ;;  %s372_s28 = sshll.u32 (!%p839_p8), %s179_s25, 3 }
  0x47   : > { %s180_s4 = scalar_lea.sflag (!%p839_p8), [#allocation3], %s179_s25  ;;  %s761_s6 = scalar_lea.vmem (!%p839_p8), [#allocation2], %s372_s28 }
  0x4d   : > { %564 = dma.done.wait (%p840_p13), %s180_s4, 128  }
  0x4e   : > { %566 = vsyncadd (%p840_p13), %s180_s4, 4294967168  ;;  %s189_s29 = scalar_lea.sflag [#allocation6], %s179_s25  ;;  %s767_s30 = scalar_lea.vmem [#allocation5], %s372_s28 }
  0x4f   : > { %568 = dma.done.wait (%p840_p13), %s189_s29, 128  }
  0x50   : > { %570 = vsyncadd (%p840_p13), %s189_s29, 4294967168  ;;  %p374_p7 = scmp.ne.s32.totalorder %s589_s12, 0 }
  0x51   : > { %v601_v0 = vmov (!%p374_p7), 0.0  }
  0x52   : > { %220 = sbr.rel (%p374_p7) target bundleno = 89 (0x59), region = 40  ;;  %221 = vst [vmem:[#allocation7] sm:$0xff] (!%p374_p7), %v601_v0 }
  0x59 PF: > { %p223_p9 = scmp.eq.s32.totalorder %s589_s12, 1 }
  0x5a   : > { %v228_v1 = vld [vmem:[%s761_s6] sm:$0xff] (%p223_p9)  ;;  %v229_v2 = vld [vmem:[%s767_s30] sm:$0xff] (%p223_p9)  ;;  %v240_v6 = vlaneseq (%p223_p9) }
  0x5b   : > { %227 = sbr.rel (!%p223_p9) target bundleno = 116 (0x74), region = 44  ;;  %v230_v3 = vsub.f32 (%p223_p9), %v228_v1, %v229_v2  ;;  %v244_v12 = vld [vmem:[#allocation7] sm:$0xff] (%p223_p9) }
  0x5c   : > { %v241_v7 = vshrl.u32 (%p223_p9), %v240_v6, 7 }
  0x5d   : > { %v231_v4 = vmul.f32 (%p223_p9), %v230_v3, %v230_v3 }
  0x5e   : > { %vm242_vm2 = vcmp.lt.s32.totalorder (%p223_p9), %v241_v7, 4 }
  0x5f   : > { %v232_v5 = vadd.f32 (%p223_p9), 1e-06, %v231_v4 }
  0x61   : > { %449 = vrsqrt.f32 (%p223_p9), %v232_v5  ;;  %vm235_vm0 = vcmp.eq.f32.partialorder (%p223_p9), %v232_v5, inf  ;;  %v238_v9 = vand.u32 (%p223_p9), 2147483648, %v232_v5  ;;  %vm237_vm1 = vcmp.eq.f32.partialorder (%p223_p9), %v232_v5, 0.0 }
  0x6b   : > { %v450_v8 = vpop.eup %449 }
  0x6c   : > { %v234_v10 = vmul.f32 %v450_v8, %v232_v5 }
  0x6e   : > { %v236_v11 = vsel %vm235_vm0, %v232_v5, %v234_v10 }
  0x6f   : > { %v239_v13 = vsel %vm237_vm1, %v238_v9, %v236_v11 }
  0x70   : > { %v243_v14 = vsel %vm242_vm2, %v239_v13, 0.0 }
  0x71   : > { %v246_v15 = vadd.f32 %v244_v12, %v243_v14 }
  0x73   : > { %247 = vst [vmem:[#allocation7] sm:$0xff] %v246_v15 }
  0x74 PF: > { %250 = sbr.rel (%p223_p9) target bundleno = 141 (0x8d), region = 48  ;;  %v251_v16 = vld [vmem:[%s761_s6] sm:$0xff] (!%p223_p9)  ;;  %v252_v17 = vld [vmem:[%s767_s30] sm:$0xff] (!%p223_p9) }
  0x75   : > { %v253_v18 = vsub.f32 (!%p223_p9), %v251_v16, %v252_v17 }
  0x77   : > { %v254_v19 = vmul.f32 (!%p223_p9), %v253_v18, %v253_v18 }
  0x79   : > { %v255_v20 = vadd.f32 (!%p223_p9), 1e-06, %v254_v19 }
  0x7a   : > { %v263_v24 = vld [vmem:[#allocation7] sm:$0xff] (!%p223_p9) }
  0x7b   : > { %451 = vrsqrt.f32 %v255_v20  ;;  %vm258_vm3 = vcmp.eq.f32.partialorder %v255_v20, inf  ;;  %v261_v22 = vand.u32 2147483648, %v255_v20  ;;  %vm260_vm4 = vcmp.eq.f32.partialorder %v255_v20, 0.0 }
  0x85   : > { %v452_v21 = vpop.eup %451 }
  0x86   : > { %v257_v23 = vmul.f32 %v452_v21, %v255_v20 }
  0x88   : > { %v259_v25 = vsel %vm258_vm3, %v255_v20, %v257_v23 }
  0x89   : > { %v262_v26 = vsel %vm260_vm4, %v261_v22, %v259_v25 }
  0x8a   : > { %v265_v27 = vadd.f32 %v263_v24, %v262_v26 }
  0x8c   : > { %266 = vst [vmem:[#allocation7] sm:$0xff] %v265_v27 }
  0x8d PF: > { %p785_p6 = scmp.eq.s32.totalorder %s364_s15, 1  ;;  %s602_s20 = smov [#allocation7]  }
  0x8e   : > { %s276_s26 = sshll.u32 %s602_s20, 4  ;;  %s277_s26 = int_to_ptr.vmem [resolvable:$true] %s276_s26 }
  0x8f   : > { %s513_s5 = scalar_lea.vmem %s277_s26, 128  ;;  %p520_p1 = scmp.lt.s32.totalorder %s277_s26, %s277_s26 }
  0x90   : > { %p514_p2 = scmp.ne.s32.totalorder %s277_s26, %s513_s5  ;;  %p521_p5 = scmp.lt.s32.totalorder %s513_s5, %s513_s5 }
  0x92   : > { %p515_p3 = pnand %p514_p2, %p785_p6  ;;  %p522_p10 = por %p521_p5, %p520_p1 }
  0x94   : > { %p516_p4 = pneg %p515_p3 }
  0x96   : > { %p523_p11 = pnand %p522_p10, %p516_p4 }
  0x98   : > { %526 = shalt.err (!%p523_p11)
}
  0x99   : > { %s527_s15 = scalar_lea.hbm %s831_s2, 128 }
  0x9a   : > { %p528_p0 = scmp.ne.s32.totalorder %s831_s2, %s527_s15  ;;  %p533_p13 = scmp.lt.u32.totalorder %s527_s15, %s831_s2 }
  0x9c   : > { %p529_p12 = pnand %p528_p0, %p785_p6 }
  0x9e   : > { %p530_p8 = pneg %p529_p12 }
  0xa0   : > { %p535_p7 = pnand %p533_p13, %p530_p8 }
  0xa2   : > { %538 = shalt.err (!%p535_p7)
}
  0xa3   : > { %386 = dma.vmem_to_hbm [thread:$0]  (%p785_p6), %s277_s26, 128, %s831_s2, [#allocation4]  }
  0xa4   : > { %572 = dma.done.wait (%p785_p6), [#allocation4], 128  }
  0xa5   : > { %574 = vsyncadd (%p785_p6), [#allocation4], 4294967168 }
  0xa6 PF: > { %s19_s14 = sadd.s32 1, %s597_s14   ;;  %s842_s9 = smov %s581_s10 }
  0xa7   : > { %p16_p9 = scmp.ge.s32.totalorder %s19_s14, 4   ;;  %s843_s10 = smov %s585_s11 }
  0xa8   : > { %s844_s11 = smov %s669_s21  ;;  %s845_s12 = smov %s593_s13 }
  0xa9   : > { %s846_s13 = smov %s848_s16  ;;  %18 = sbr.rel (!%p16_p9) target bundleno = 7 (0x7), region = 91 }
  0xb0   :  { %289 = vsyncpa [#allocation3], 1 }
  0xb1   :  { %291 = vsyncpa [#allocation3 + $0x1], 1 }
  0xb2   :  { %292 = vsyncpa [#allocation6], 1 }
  0xb3   :  { %294 = vsyncpa [#allocation6 + $0x1], 1 }
  0xb4   :  { %295 = vsyncpa [#allocation4], 1 }
  0xb5   :  { %297 = vsyncpa [#allocation4 + $0x1], 1 }

</bundles_post_ra>
